<compile_context>
chip_gen: v5e
topology: v5e:2x2
jax: 0.10.0
libtpu: 0.0.40
codegen_flags: <defaults>
</compile_context>

<pallas_src>
import functools

import jax
import jax.numpy as jnp
from jax.experimental import pallas as pl
from jax.experimental.pallas import tpu as pltpu


def _round_up(x, m):
    return ((x + m - 1) // m) * m


def _actor_kernel(state_ref, w1_ref, b1_ref, w2_ref, b2_ref, w3_ref, b3_ref,
                  out_ref, *, action_range):
    # All three Linear layers + activations fused; batch tile on the lane axis.
    x = state_ref[...]                                                    # (state_dim, T)

    a = jnp.dot(w1_ref[...], x, preferred_element_type=jnp.float32) + b1_ref[...]
    a = jnp.maximum(a, 0.0)                                               # (16, T)

    a = jnp.dot(w2_ref[...], a, preferred_element_type=jnp.float32) + b2_ref[...]
    a = jnp.maximum(a, 0.0)                                               # (16, T)

    a = jnp.dot(w3_ref[...], a, preferred_element_type=jnp.float32) + b3_ref[...]
    out_ref[...] = jnp.tanh(a) * action_range                             # (action_dim, T)


def actor_forward(state, params, action_range, *, tile_b=4096):
    """Fused Actor forward pass.

    state:  (B, state_dim) float32
    params: PyTorch-layout weights: w1 (16,state_dim), b1 (16,1), w2 (16,16),
            b2 (16,1), w3 (action_dim,16), b3 (action_dim,1)
    returns (B, action_dim) float32
    """
    B, state_dim = state.shape
    hidden = params["w1"].shape[0]
    action_dim = params["w3"].shape[0]

    # Lane-aligned batch tile: multiple of 128, capped at tile_b; pad B up to a
    # whole number of tiles so all stores are unmasked and DMAs rectangular.
    tile = min(int(tile_b), _round_up(max(B, 1), 128))
    b_pad = _round_up(B, tile)

    # Transpose so batch maps to lanes; zero-pad the batch remainder.
    state_t = jnp.pad(state.astype(jnp.float32).T, ((0, 0), (0, b_pad - B)))

    resident = lambda i: (0, 0)  # weights/biases stay resident across grid steps
    kernel = functools.partial(_actor_kernel, action_range=float(action_range))

    out_t = pl.pallas_call(
        kernel,
        out_shape=jax.ShapeDtypeStruct((action_dim, b_pad), jnp.float32),
        grid_spec=pltpu.PrefetchScalarGridSpec(
            num_scalar_prefetch=0,
            grid=(b_pad // tile,),
            in_specs=[
                pl.BlockSpec((state_dim, tile), lambda i: (0, i)),
                pl.BlockSpec((hidden, state_dim), resident),
                pl.BlockSpec((hidden, 1), resident),
                pl.BlockSpec((hidden, hidden), resident),
                pl.BlockSpec((hidden, 1), resident),
                pl.BlockSpec((action_dim, hidden), resident),
                pl.BlockSpec((action_dim, 1), resident),
            ],
            out_specs=pl.BlockSpec((action_dim, tile), lambda i: (0, i)),
        ),
        compiler_params=pltpu.CompilerParams(
            dimension_semantics=("parallel",)),
    )(state_t, params["w1"], params["b1"], params["w2"], params["b2"],
      params["w3"], params["b3"])

    return out_t[:, :B].T


def init_actor_params(key, state_dim, action_dim, hidden=16):
    """Deterministic synthetic init matching nn.Linear shapes ((out, in) layout)."""
    ks = jax.random.split(key, 6)

    def linear(kw, kb, fan_in, fan_out):
        bound = 1.0 / jnp.sqrt(float(fan_in))
        w = jax.random.uniform(kw, (fan_out, fan_in), jnp.float32, -bound, bound)
        b = jax.random.uniform(kb, (fan_out, 1), jnp.float32, -bound, bound)
        return w, b

    w1, b1 = linear(ks[0], ks[1], state_dim, hidden)
    w2, b2 = linear(ks[2], ks[3], hidden, hidden)
    w3, b3 = linear(ks[4], ks[5], hidden, action_dim)
    return {"w1": w1, "b1": b1, "w2": w2, "b2": b2, "w3": w3, "b3": b3}


def actor_forward_ref(state, params, action_range):
    """Pure-JAX reference (PyTorch semantics) for correctness checking."""
    a = jax.nn.relu(state @ params["w1"].T + params["b1"].T)
    a = jax.nn.relu(a @ params["w2"].T + params["b2"].T)
    return jnp.tanh(a @ params["w3"].T + params["b3"].T) * action_range


if __name__ == "__main__":
    key = jax.random.PRNGKey(0)
    k_param, k_state, k_state2 = jax.random.split(key, 3)

    state_dim = 4
    action_dim = 2
    action_range = 2.0

    params = init_actor_params(k_param, state_dim, action_dim)

    # Small-shape check (single grid step, batch padded to one 128-lane tile).
    state = jax.random.normal(k_state, (2, state_dim), jnp.float32)
    out = jax.block_until_ready(actor_forward(state, params, action_range))
    ref = actor_forward_ref(state, params, action_range)
    assert out.shape == (2, action_dim)
    assert jnp.allclose(out, ref, atol=1e-5, rtol=1e-5)

    # Multi-tile check: exercises the batch grid and remainder padding.
    state2 = jax.random.normal(k_state2, (300, state_dim), jnp.float32)
    out2 = jax.block_until_ready(
        actor_forward(state2, params, action_range, tile_b=128))
    ref2 = actor_forward_ref(state2, params, action_range)
    assert out2.shape == (300, action_dim)
    assert jnp.allclose(out2, ref2, atol=1e-5, rtol=1e-5)

    print("KERNEL_OK")
</pallas_src>

<mosaic_0001>
module attributes {stable_mosaic.version = 11 : i64} {
  func.func @_actor_kernel(%arg0: i32, %arg1: memref<4x128xf32, #tpu.memory_space<vmem>>, %arg2: memref<16x4xf32, #tpu.memory_space<vmem>>, %arg3: memref<16x1xf32, #tpu.memory_space<vmem>>, %arg4: memref<16x16xf32, #tpu.memory_space<vmem>>, %arg5: memref<16x1xf32, #tpu.memory_space<vmem>>, %arg6: memref<2x16xf32, #tpu.memory_space<vmem>>, %arg7: memref<2x1xf32, #tpu.memory_space<vmem>>, %arg8: memref<2x128xf32, #tpu.memory_space<vmem>>) attributes {dimension_semantics = [#tpu.dimension_semantics<parallel>], iteration_bounds = array<i64: 1>, scalar_prefetch = 0 : i64, scratch_operands = 0 : i64, tpu.core_type = #tpu.core_type<tc>, window_params = [{transform_indices = @transform_0, window_bounds = array<i64: 4, 128>}, {pipeline_mode = #tpu.pipeline_mode<synchronous>, transform_indices = @transform_1, window_bounds = array<i64: 16, 4>}, {pipeline_mode = #tpu.pipeline_mode<synchronous>, transform_indices = @transform_2, window_bounds = array<i64: 16, 1>}, {pipeline_mode = #tpu.pipeline_mode<synchronous>, transform_indices = @transform_3, window_bounds = array<i64: 16, 16>}, {pipeline_mode = #tpu.pipeline_mode<synchronous>, transform_indices = @transform_4, window_bounds = array<i64: 16, 1>}, {pipeline_mode = #tpu.pipeline_mode<synchronous>, transform_indices = @transform_5, window_bounds = array<i64: 2, 16>}, {pipeline_mode = #tpu.pipeline_mode<synchronous>, transform_indices = @transform_6, window_bounds = array<i64: 2, 1>}, {transform_indices = @transform_7, window_bounds = array<i64: 2, 128>}]} {
    %c0 = arith.constant 0 : index
    %c0_0 = arith.constant 0 : index
    %0 = vector.load %arg1[%c0, %c0_0] : memref<4x128xf32, #tpu.memory_space<vmem>>, vector<4x128xf32>
    %c0_1 = arith.constant 0 : index
    %c0_2 = arith.constant 0 : index
    %1 = vector.load %arg2[%c0_1, %c0_2] : memref<16x4xf32, #tpu.memory_space<vmem>>, vector<16x4xf32>
    %cst = arith.constant dense<0.000000e+00> : vector<16x128xf32>
    %2 = tpu.matmul %1, %0, %cst {dimension_numbers = #tpu.dot_dimension_numbers<[1], [0], [0], [1], [0, 0, 1, 1], [], []>} : vector<16x4xf32>, vector<4x128xf32>, vector<16x128xf32> -> vector<16x128xf32>
    %c0_3 = arith.constant 0 : index
    %c0_4 = arith.constant 0 : index
    %3 = vector.load %arg3[%c0_3, %c0_4] : memref<16x1xf32, #tpu.memory_space<vmem>>, vector<16x1xf32>
    %4 = vector.broadcast %3 : vector<16x1xf32> to vector<16x128xf32>
    %5 = arith.addf %2, %4 : vector<16x128xf32>
    %cst_5 = arith.constant 0.000000e+00 : f32
    %6 = vector.broadcast %cst_5 : f32 to vector<16x128xf32>
    %7 = arith.maximumf %5, %6 : vector<16x128xf32>
    %c0_6 = arith.constant 0 : index
    %c0_7 = arith.constant 0 : index
    %8 = vector.load %arg4[%c0_6, %c0_7] : memref<16x16xf32, #tpu.memory_space<vmem>>, vector<16x16xf32>
    %cst_8 = arith.constant dense<0.000000e+00> : vector<16x128xf32>
    %9 = tpu.matmul %8, %7, %cst_8 {dimension_numbers = #tpu.dot_dimension_numbers<[1], [0], [0], [1], [0, 0, 1, 1], [], []>} : vector<16x16xf32>, vector<16x128xf32>, vector<16x128xf32> -> vector<16x128xf32>
    %c0_9 = arith.constant 0 : index
    %c0_10 = arith.constant 0 : index
    %10 = vector.load %arg5[%c0_9, %c0_10] : memref<16x1xf32, #tpu.memory_space<vmem>>, vector<16x1xf32>
    %11 = vector.broadcast %10 : vector<16x1xf32> to vector<16x128xf32>
    %12 = arith.addf %9, %11 : vector<16x128xf32>
    %cst_11 = arith.constant 0.000000e+00 : f32
    %13 = vector.broadcast %cst_11 : f32 to vector<16x128xf32>
    %14 = arith.maximumf %12, %13 : vector<16x128xf32>
    %c0_12 = arith.constant 0 : index
    %c0_13 = arith.constant 0 : index
    %15 = vector.load %arg6[%c0_12, %c0_13] : memref<2x16xf32, #tpu.memory_space<vmem>>, vector<2x16xf32>
    %cst_14 = arith.constant dense<0.000000e+00> : vector<2x128xf32>
    %16 = tpu.matmul %15, %14, %cst_14 {dimension_numbers = #tpu.dot_dimension_numbers<[1], [0], [0], [1], [0, 0, 1, 1], [], []>} : vector<2x16xf32>, vector<16x128xf32>, vector<2x128xf32> -> vector<2x128xf32>
    %c0_15 = arith.constant 0 : index
    %c0_16 = arith.constant 0 : index
    %17 = vector.load %arg7[%c0_15, %c0_16] : memref<2x1xf32, #tpu.memory_space<vmem>>, vector<2x1xf32>
    %18 = vector.broadcast %17 : vector<2x1xf32> to vector<2x128xf32>
    %19 = arith.addf %16, %18 : vector<2x128xf32>
    %20 = math.tanh %19 : vector<2x128xf32>
    %cst_17 = arith.constant 2.000000e+00 : f32
    %21 = vector.broadcast %cst_17 : f32 to vector<2x128xf32>
    %22 = arith.mulf %20, %21 : vector<2x128xf32>
    %c0_18 = arith.constant 0 : index
    %c0_19 = arith.constant 0 : index
    %23 = vector.load %arg8[%c0_18, %c0_19] : memref<2x128xf32, #tpu.memory_space<vmem>>, vector<2x128xf32>
    tpu.vector_store %arg8[%c0_18, %c0_19], %22 {strides = array<i32>} : memref<2x128xf32, #tpu.memory_space<vmem>>, vector<2x128xf32>,
    return
  }
  func.func @transform_0(%arg0: i32) -> (i32, i32) {
    %c0_i32 = arith.constant 0 : i32
    %c0_i32_0 = arith.constant 0 : i32
    return %c0_i32, %arg0 : i32, i32
  }
  func.func @transform_1(%arg0: i32) -> (i32, i32) {
    %c0_i32 = arith.constant 0 : i32
    %c0_i32_0 = arith.constant 0 : i32
    %c0_i32_1 = arith.constant 0 : i32
    return %c0_i32, %c0_i32_0 : i32, i32
  }
  func.func @transform_2(%arg0: i32) -> (i32, i32) {
    %c0_i32 = arith.constant 0 : i32
    %c0_i32_0 = arith.constant 0 : i32
    %c0_i32_1 = arith.constant 0 : i32
    return %c0_i32, %c0_i32_0 : i32, i32
  }
  func.func @transform_3(%arg0: i32) -> (i32, i32) {
    %c0_i32 = arith.constant 0 : i32
    %c0_i32_0 = arith.constant 0 : i32
    %c0_i32_1 = arith.constant 0 : i32
    return %c0_i32, %c0_i32_0 : i32, i32
  }
  func.func @transform_4(%arg0: i32) -> (i32, i32) {
    %c0_i32 = arith.constant 0 : i32
    %c0_i32_0 = arith.constant 0 : i32
    %c0_i32_1 = arith.constant 0 : i32
    return %c0_i32, %c0_i32_0 : i32, i32
  }
  func.func @transform_5(%arg0: i32) -> (i32, i32) {
    %c0_i32 = arith.constant 0 : i32
    %c0_i32_0 = arith.constant 0 : i32
    %c0_i32_1 = arith.constant 0 : i32
    return %c0_i32, %c0_i32_0 : i32, i32
  }
  func.func @transform_6(%arg0: i32) -> (i32, i32) {
    %c0_i32 = arith.constant 0 : i32
    %c0_i32_0 = arith.constant 0 : i32
    %c0_i32_1 = arith.constant 0 : i32
    return %c0_i32, %c0_i32_0 : i32, i32
  }
  func.func @transform_7(%arg0: i32) -> (i32, i32) {
    %c0_i32 = arith.constant 0 : i32
    %c0_i32_0 = arith.constant 0 : i32
    return %c0_i32, %arg0 : i32, i32
  }
}

</mosaic_0001>

<bundles_post_ra>
// kernel: tpu_custom_call.1
= control target key start
LH: loop header
LB: loop body
LE: loop exit
PB: predicated region body
PF: predicated region fallthrough
CT: control target
= control target key end

     0   :  { %vm49_vm0 = vcmask 1043456   ;;  %vm42_vm1 = vcmask 31744   ;;  %v214_v2 = vmov 0   ;;  %s295_s0 = inlined_call_operand.vmem [shape: f32[4,128], index: 0, kind: input, shape index: {}]   ;;  %s296_s1 = inlined_call_operand.vmem [shape: f32[16,4], index: 1, kind: input, shape index: {}]   ;;  %s297_s2 = inlined_call_operand.vmem [shape: f32[16,1], index: 2, kind: input, shape index: {}]   ;;  %s298_s3 = inlined_call_operand.vmem [shape: f32[16,16], index: 3, kind: input, shape index: {}]   ;;  %s299_s4 = inlined_call_operand.vmem [shape: f32[16,1], index: 4, kind: input, shape index: {}]   ;;  %s300_s5 = inlined_call_operand.vmem [shape: f32[2,16], index: 5, kind: input, shape index: {}]   ;;  %s301_s6 = inlined_call_operand.vmem [shape: f32[2,1], index: 6, kind: input, shape index: {}]   ;;  %s302_s7 = inlined_call_operand.hbm [shape: f32[2,128], index: 7, kind: output, shape index: {}]  }
   0x1   :  { %v27_v0 = vld [vmem:[%s295_s0] sm:$0xf]  ;;  %183 = vset.pattern.permute.xlu0 %v214_v2  ;;  %v31_v3 = vld [vmem:[%s297_s2 + $0x8] sm:$0xff] }
   0x2   :  { %v28_v1 = vld [vmem:[%s296_s1] sm:$0xff]  ;;  %173 = vmatpush.msk.msra.mxu0 %vm49_vm0, %v27_v0  ;;  %39 = vperm.xlu0 %183, %v31_v3  }
   0x3   :  { %174 = vmatmul.msk.f32.vlgmr.msra.gmra.mxu0 %vm42_vm1, %v28_v1 }
   0x4   :  { %12 = vsyncpa [#allocation3], 0  ;;  %184 = vset.pattern.permute.xlu1 %v214_v2  ;;  %185 = vset.pattern.permute.xlu2 %v214_v2  ;;  %v29_v4 = vld [vmem:[%s296_s1 + $0x8] sm:$0xff]  ;;  %v30_v5 = vld [vmem:[%s297_s2] sm:$0xff]  ;;  %vm92_vm2 = vcmask 130048   ;;  %s164_s21 = sshll.u32 %s302_s7, 4  ;;  %s165_s21 = int_to_ptr.hbm [resolvable:$true] %s164_s21 }
   0x5   :  { %v81_v6 = vld [vmem:[%s299_s4 + $0x8] sm:$0xff]  ;;  %v80_v7 = vld [vmem:[%s299_s4] sm:$0xff] }
   0x6   :  { %89 = vperm.xlu1 %184, %v81_v6   ;;  %v78_v16 = vld [vmem:[%s298_s3] sm:$0xff]  ;;  %v79_v17 = vld [vmem:[%s298_s3 + $0x8] sm:$0xff] }
   0x7   :  { %v125_v18 = vld [vmem:[%s301_s6] sm:$0x3]  ;;  %s215_s6 = smov [#allocation2]  }
   0x8   :  { %128 = vperm.xlu2 %185, %v125_v18   ;;  %v124_v27 = vld [vmem:[%s300_s5] sm:$0x3]  ;;  %s162_s18 = sshll.u32 %s215_s6, 4  ;;  %s163_s18 = int_to_ptr.vmem [resolvable:$true] %s162_s18 }
   0xa   :  { %34 = vperm.xlu0 %183, %v30_v5  }
   0xb   :  { %175 = vmatmul.msk.f32.gmra.mxu0 %vm42_vm1, %v29_v4 }
   0xe   :  { %84 = vperm.xlu1 %184, %v80_v7  }
  0x62   :  { %v129_v28 = vpop.permute.xlu2 %128 }
  0x74   :  { %v40_v8 = vpop.permute.xlu0 %39 }
  0x78   :  { %v90_v19 = vpop.permute.xlu1 %89 }
  0x7c   :  { %v35_v10 = vpop.permute.xlu0 %34 }
  0x80   :  { %v70_v9 = vpop.f32.mrf.mxu0  ;;  %v85_v20 = vpop.permute.xlu1 %84 }
  0x81   :  { %v71_v12 = vadd.f32 %v70_v9, %v35_v10 }
  0x83   :  { %v76_v15 = vmax.f32 %v71_v12, 0.0 }
  0x88   :  { %v73_v11 = vpop.f32.mrf.mxu0 }
  0x89   :  { %v74_v13 = vadd.f32 %v73_v11, %v40_v8 }
  0x8b   :  { %v77_v14 = vmax.f32 %v74_v13, 0.0 }
  0x8d   :  { %113 = vmatpush.msra.mxu1 %v77_v14  ;;  %179 = vmatpush.msra.mxu3 %v77_v14 }
  0x8f   :  { %114 = vmatpush.msra.mxu1 %v76_v15  ;;  %180 = vmatpush.msra.mxu3 %v76_v15 }
  0x90   :  { %176 = vmatmul.msk.f32.vlgmr.msra.gmra.mxu1 %vm92_vm2, %v78_v16  ;;  %177 = vmatmul.msk.f32.vlgmr.msra.gmra.mxu3 %vm92_vm2, %v79_v17 }
 0x10d   :  { %v116_v21 = vpop.f32.mrf.mxu1 }
 0x10e   :  { %v117_v23 = vadd.f32 %v116_v21, %v85_v20 }
 0x110   :  { %v122_v26 = vmax.f32 %v117_v23, 0.0 }
 0x113   :  { %v119_v22 = vpop.f32.mrf.mxu3 }
 0x114   :  { %v120_v24 = vadd.f32 %v119_v22, %v90_v19 }
 0x116   :  { %v123_v25 = vmax.f32 %v120_v24, 0.0 }
 0x118   :  { %148 = vmatpush.msra.mxu2 %v123_v25 }
 0x11a   :  { %149 = vmatpush.msra.mxu2 %v122_v26 }
 0x11b   :  { %178 = vmatmul.msk.f32.vlgmr.msra.gmra.mxu2 %vm92_vm2, %v124_v27 }
 0x19e   :  { %v151_v29 = vpop.f32.mrf.mxu2 }
 0x19f   :  { %v152_v30 = vadd.f32 %v151_v29, %v129_v28 }
 0x1a1   :  { %186 = vtanh.f32 %v152_v30 }
 0x1a7   :  { %v187_v31 = vpop.eup %186 }
 0x1a8   :  { %v155_v32 = vmul.f32 2.0, %v187_v31 }
 0x1aa   :  { %156 = vst [vmem:[#allocation2] sm:$0x3] %v155_v32 }
 0x1ab   :  { %167 = dma.vmem_to_hbm [thread:$0]  %s163_s18, 32, %s165_s21, [#allocation3]  }
 0x1ac   :  { %212 = dma.done.wait [#allocation3], 32  }
 0x1ad   :  { %213 = vsyncadd [#allocation3], 4294967264 }
 0x1ae   :  { %172 = vsyncpa [#allocation3], 1 }

</bundles_post_ra>
